<compile_context>
chip_gen: v7x
topology: tpu7x:2x2x1
jax: 0.10.0
libtpu: 0.0.40
codegen_flags: <defaults>
</compile_context>

<pallas_src>
import jax
import jax.numpy as jnp
from jax.experimental import pallas as pl
from jax.experimental.pallas import tpu as pltpu


def _copy_kernel(x_ref, o_ref):
    # Pure passthrough of the current lane-dense tile.
    o_ref[...] = x_ref[...]


_LANE = 128
_PER_BUFFER_VMEM_BYTES = 4 * 1024 * 1024  # keep 2x(in)+2x(out) ~= 16 MiB max
_SUBLANE_PACK = {8: 8, 4: 8, 2: 16, 1: 32}  # itemsize -> sublane pack factor


def _round_up(x: int, m: int) -> int:
    return ((x + m - 1) // m) * m


def _pallas_identity(x: jax.Array) -> jax.Array:
    """Copy `x` through a tiled, lane-dense Pallas TPU kernel (bitwise identity)."""
    x = jnp.asarray(x)
    orig_shape, orig_dtype = x.shape, x.dtype
    n = x.size
    if n == 0:
        return x  # nothing to move; skip the kernel entirely

    itemsize = jnp.dtype(orig_dtype).itemsize
    pack = _SUBLANE_PACK.get(itemsize, 8)

    # Lane-dense slab width: widest multiple of 128 that still yields at least
    # one full sublane-pack worth of rows (avoids over-padding tiny inputs).
    cols = _LANE
    for c in (2048, 1024, 512, 256):
        if n >= c * pack:
            cols = c
            break

    # Largest row tile that fits the per-buffer VMEM budget, aligned to the
    # dtype's sublane pack so every vreg is fully populated.
    max_tile_rows = max(
        pack, (_PER_BUFFER_VMEM_BYTES // (cols * itemsize)) // pack * pack
    )

    rows = (n + cols - 1) // cols
    tile_rows = min(max_tile_rows, _round_up(rows, pack))
    rows_padded = _round_up(rows, tile_rows)
    n_padded = rows_padded * cols

    flat = x.reshape(-1)
    if n_padded != n:
        flat = jnp.pad(flat, (0, n_padded - n))
    slab = flat.reshape(rows_padded, cols)

    grid = (rows_padded // tile_rows,)
    spec = pl.BlockSpec((tile_rows, cols), lambda i: (i, 0))

    out = pl.pallas_call(
        _copy_kernel,
        out_shape=jax.ShapeDtypeStruct((rows_padded, cols), orig_dtype),
        grid=grid,
        in_specs=[spec],
        out_specs=spec,
        compiler_params=pltpu.CompilerParams(
            dimension_semantics=("parallel",)  # lets v7x shard across its 2 TCs
        ),
        cost_estimate=pl.CostEstimate(
            flops=0,
            transcendentals=0,
            bytes_accessed=2 * n_padded * itemsize,
        ),
    )(slab)

    return out.reshape(-1)[:n].reshape(orig_shape)


class DictKeysModule:
    """JAX/Pallas equivalent of the PyTorch DictKeysModule."""

    def __init__(self, keys, copy_preds_through_pallas: bool = True):
        self.keys = list(keys)
        # Perf note: the op is a pure passthrough, so the fastest correct
        # implementation returns the traversed array directly. We keep one
        # Pallas copy on the feature tensor (toggleable) to exercise the
        # kernel; `targets` is never routed through a kernel.
        self.copy_preds_through_pallas = copy_preds_through_pallas

    def __call__(self, features_dict, targets):
        # Dict traversal: pure Python glue, no tensor semantics.
        for k in self.keys:
            features_dict = features_dict[k]
        preds = (
            _pallas_identity(features_dict)
            if self.copy_preds_through_pallas
            else features_dict
        )
        # targets: direct passthrough — no kernel launch for an 8-byte array.
        return {"preds": preds, "target": targets}


if __name__ == "__main__":
    key = jax.random.PRNGKey(0)
    k_feat, k_tgt, k_odd = jax.random.split(key, 3)

    # Nested features dict mimicking {"backbone": {"x_norm_clstoken": feat}}
    # feat: (B, C, H, W) = (2, 4, 16, 16), NCHW as in PyTorch.
    feat = jax.random.normal(k_feat, (2, 4, 16, 16), dtype=jnp.float32)
    features_dict = {"backbone": {"x_norm_clstoken": feat}}

    # Targets: integer class labels, batch of 2.
    targets = jax.random.randint(k_tgt, (2,), 0, 10, dtype=jnp.int32)

    module = DictKeysModule(keys=["backbone", "x_norm_clstoken"])
    out = module(features_dict, targets)
    jax.block_until_ready(out)

    # Semantic check: exact passthrough.
    assert out["preds"].shape == feat.shape and out["preds"].dtype == feat.dtype
    assert bool(jnp.all(out["preds"] == feat))
    assert out["target"].shape == targets.shape and out["target"].dtype == targets.dtype
    assert bool(jnp.all(out["target"] == targets))

    # Robustness check: odd size + bf16 exercises the padded, sublane-packed path.
    x_odd = jax.random.normal(k_odd, (3, 5, 7), dtype=jnp.bfloat16)
    y_odd = _pallas_identity(x_odd)
    jax.block_until_ready(y_odd)
    assert y_odd.shape == x_odd.shape and y_odd.dtype == x_odd.dtype
    assert bool(jnp.all(y_odd == x_odd))

    print("KERNEL_OK")
</pallas_src>

<mosaic_0001>
module attributes {stable_mosaic.version = 11 : i64} {
  func.func @_copy_kernel(%arg0: i32, %arg1: memref<8x256xf32, #tpu.memory_space<vmem>>, %arg2: memref<8x256xf32, #tpu.memory_space<vmem>>) attributes {dimension_semantics = [#tpu.dimension_semantics<parallel>], iteration_bounds = array<i64: 1>, scalar_prefetch = 0 : i64, scratch_operands = 0 : i64, tpu.core_type = #tpu.core_type<tc>, window_params = [{transform_indices = @transform_0, window_bounds = array<i64: 8, 256>}, {transform_indices = @transform_1, window_bounds = array<i64: 8, 256>}]} {
    %c0 = arith.constant 0 : index
    %c0_0 = arith.constant 0 : index
    %0 = vector.load %arg1[%c0, %c0_0] : memref<8x256xf32, #tpu.memory_space<vmem>>, vector<8x256xf32>
    %c0_1 = arith.constant 0 : index
    %c0_2 = arith.constant 0 : index
    %1 = vector.load %arg2[%c0_1, %c0_2] : memref<8x256xf32, #tpu.memory_space<vmem>>, vector<8x256xf32>
    tpu.vector_store %arg2[%c0_1, %c0_2], %0 {strides = array<i32>} : memref<8x256xf32, #tpu.memory_space<vmem>>, vector<8x256xf32>,
    return
  }
  func.func @transform_0(%arg0: i32) -> (i32, i32) {
    %c0_i32 = arith.constant 0 : i32
    %c0_i32_0 = arith.constant 0 : i32
    return %arg0, %c0_i32 : i32, i32
  }
  func.func @transform_1(%arg0: i32) -> (i32, i32) {
    %c0_i32 = arith.constant 0 : i32
    %c0_i32_0 = arith.constant 0 : i32
    return %arg0, %c0_i32 : i32, i32
  }
}

</mosaic_0001>

<bundles_post_ra>
// kernel: tpu_custom_call.1
= control target key start
LH: loop header
LB: loop body
LE: loop exit
PB: predicated region body
PF: predicated region fallthrough
CT: control target
= control target key end

     0   :  { %6 = vsyncpa [#allocation3], 0  ;;  %s126_s0 = inlined_call_operand.hbm [shape: f32[8,256], index: 0, kind: input, shape index: {}]   ;;  %s127_s1 = inlined_call_operand.hbm [shape: f32[8,256], index: 1, kind: output, shape index: {}]  }
   0x1   :  { %7 = vsyncpa [#allocation4], 0  ;;  %s90_s6 = smov [#allocation2]   ;;  %s42_s10 = scalar_lea.hbm %s126_s0, 256 }
   0x2   :  { %s14_s7 = sshll.u32 %s90_s6, 4  ;;  %p43_p0 = scmp.ne.s32.totalorder %s126_s0, %s42_s10  ;;  %s15_s7 = int_to_ptr.vmem [resolvable:$true] %s14_s7 }
   0x3   :  { %p46_p1 = scmp.lt.u32.totalorder %s42_s10, %s126_s0 }
   0x5   :  { %p48_p2 = pnand %p46_p1, %p43_p0 }
   0x7   :  { %51 = shalt.err (!%p48_p2)
}
   0x8   :  { %s52_s15 = scalar_lea.vmem %s15_s7, 256  ;;  %p57_p4 = scmp.lt.s32.totalorder %s15_s7, %s15_s7 }
   0x9   :  { %p53_p3 = scmp.ne.s32.totalorder %s15_s7, %s52_s15  ;;  %p58_p5 = scmp.lt.s32.totalorder %s52_s15, %s52_s15 }
   0xb   :  { %p59_p6 = por %p58_p5, %p57_p4 }
   0xd   :  { %p60_p7 = pnand %p59_p6, %p53_p3 }
   0xf   :  { %63 = shalt.err (!%p60_p7)
}
  0x10   :  { %17 = dma.hbm_to_vmem [thread:$0]  %s126_s0, 256, %s15_s7, [#allocation3]  }
  0x11   :  { %86 = dma.done.wait [#allocation3], 256  }
  0x12   :  { %87 = vsyncadd [#allocation3], 4294967040  ;;  %s91_s18 = smov [#allocation5]   ;;  %v21_v0 = vld [vmem:[#allocation2] sm:$0xff]  ;;  %v22_v1 = vld [vmem:[#allocation2 + $0x8] sm:$0xff] }
  0x13   :  { %s31_s19 = sshll.u32 %s91_s18, 4  ;;  %23 = vst [vmem:[#allocation5] sm:$0xff] %v21_v0  ;;  %24 = vst [vmem:[#allocation5 + $0x8] sm:$0xff] %v22_v1  ;;  %s32_s19 = int_to_ptr.vmem [resolvable:$true] %s31_s19 }
  0x14   :  { %s64_s20 = scalar_lea.vmem %s32_s19, 256  ;;  %p69_p9 = scmp.lt.s32.totalorder %s32_s19, %s32_s19 }
  0x15   :  { %p65_p8 = scmp.ne.s32.totalorder %s32_s19, %s64_s20  ;;  %p70_p10 = scmp.lt.s32.totalorder %s64_s20, %s64_s20 }
  0x17   :  { %p71_p11 = por %p70_p10, %p69_p9 }
  0x19   :  { %p72_p12 = pnand %p71_p11, %p65_p8 }
  0x1b   :  { %75 = shalt.err (!%p72_p12)
}
  0x1c   :  { %s76_s0 = scalar_lea.hbm %s127_s1, 256 }
  0x1d   :  { %p77_p13 = scmp.ne.s32.totalorder %s127_s1, %s76_s0  ;;  %p80_p0 = scmp.lt.u32.totalorder %s76_s0, %s127_s1 }
  0x1f   :  { %p82_p1 = pnand %p80_p0, %p77_p13 }
  0x21   :  { %85 = shalt.err (!%p82_p1)
}
  0x22   :  { %34 = dma.vmem_to_hbm [thread:$0]  %s32_s19, 256, %s127_s1, [#allocation4]  }
  0x23   :  { %88 = dma.done.wait [#allocation4], 256  }
  0x24   :  { %89 = vsyncadd [#allocation4], 4294967040 }
  0x25   :  { %38 = vsyncpa [#allocation3], 1 }
  0x26   :  { %39 = vsyncpa [#allocation4], 1 }

</bundles_post_ra>
